<compile_context>
chip_gen: v7x
topology: tpu7x:2x2x1
jax: 0.10.0
libtpu: 0.0.40
codegen_flags: <defaults>
</compile_context>

<pallas_src>
import jax
import jax.numpy as jnp
from jax.experimental import pallas as pl
from jax.experimental.pallas import tpu as pltpu


# --------------------------------------------------------------------------
# tiling helpers
# --------------------------------------------------------------------------
def _pick_chunk(n):
    """Time-step chunk: full sequence if short, else a multiple-of-8 divisor."""
    if n <= 16:
        return n
    for c in (16, 8):
        if n % c == 0:
            return c
    return n  # fallback: single chunk


def _pick_rows(m, cap=256):
    """Row tile (second-to-last dim): full if small, else a /8 divisor."""
    if m <= cap:
        return m
    for c in (256, 128, 64, 32, 16, 8):
        if m % c == 0:
            return c
    return m


def _pick_cols(n, cap=512):
    if n <= cap:
        return n
    for c in (512, 256, 128):
        if n % c == 0:
            return c
    return n


# --------------------------------------------------------------------------
# Hoisted input projection:  (M, K) @ (K, N) + b  (bf16 in, f32 accumulate)
# --------------------------------------------------------------------------
def _matmul_bias_kernel(x_ref, w_ref, b_ref, o_ref):
    o_ref[...] = (jnp.dot(x_ref[...], w_ref[...],
                          preferred_element_type=jnp.float32) + b_ref[...])


def matmul_bias(x_bf, w_bf, b_f32):
    M, K = x_bf.shape
    N = w_bf.shape[1]
    tm, tn = _pick_rows(M), _pick_cols(N)
    return pl.pallas_call(
        _matmul_bias_kernel,
        out_shape=jax.ShapeDtypeStruct((M, N), jnp.float32),
        grid_spec=pltpu.PrefetchScalarGridSpec(
            num_scalar_prefetch=0,
            grid=(M // tm, N // tn),
            in_specs=[
                pl.BlockSpec((tm, K), lambda i, j: (i, 0)),
                pl.BlockSpec((K, tn), lambda i, j: (0, j)),
                pl.BlockSpec((1, tn), lambda i, j: (0, j)),
            ],
            out_specs=pl.BlockSpec((tm, tn), lambda i, j: (i, j)),
        ),
        compiler_params=pltpu.CompilerParams(
            dimension_semantics=("parallel", "parallel")),
    )(x_bf, w_bf, b_f32)


# --------------------------------------------------------------------------
# Encoder GRU recurrence: chunk of time steps per grid iteration.
# gi (input projection) is precomputed; only h @ W_hh stays in the loop.
# --------------------------------------------------------------------------
def _gru_encoder_kernel(gi_ref, h0_ref, whh_ref, bhh_ref,
                        enc_out_ref, hlast_ref, h_scratch):
    H = h_scratch.shape[-1]
    TC = gi_ref.shape[0]
    c = pl.program_id(0)

    @pl.when(c == 0)
    def _():
        h_scratch[...] = h0_ref[...]

    def step(i, h):
        gi = gi_ref[i]                                         # (B, 3H) f32
        gh = jnp.dot(h.astype(jnp.bfloat16), whh_ref[...],
                     preferred_element_type=jnp.float32) + bhh_ref[...]
        r = jax.nn.sigmoid(gi[:, 0:H] + gh[:, 0:H])
        z = jax.nn.sigmoid(gi[:, H:2 * H] + gh[:, H:2 * H])
        n = jnp.tanh(gi[:, 2 * H:3 * H] + r * gh[:, 2 * H:3 * H])
        h_new = (1.0 - z) * n + z * h
        enc_out_ref[i] = h_new
        return h_new

    h_final = jax.lax.fori_loop(0, TC, step, h_scratch[...], unroll=(TC <= 16))
    h_scratch[...] = h_final

    @pl.when(c == pl.num_programs(0) - 1)
    def _():
        hlast_ref[...] = h_final


def encoder_recurrence(gi_all, h0, whh_bf, bhh):
    S, B, G = gi_all.shape
    H = h0.shape[-1]
    tc = _pick_chunk(S)
    return pl.pallas_call(
        _gru_encoder_kernel,
        out_shape=(jax.ShapeDtypeStruct((S, B, H), jnp.float32),
                   jax.ShapeDtypeStruct((B, H), jnp.float32)),
        grid_spec=pltpu.PrefetchScalarGridSpec(
            num_scalar_prefetch=0,
            grid=(S // tc,),
            in_specs=[
                pl.BlockSpec((tc, B, G), lambda c: (c, 0, 0)),
                pl.BlockSpec((B, H), lambda c: (0, 0)),
                pl.BlockSpec((H, 3 * H), lambda c: (0, 0)),
                pl.BlockSpec((1, 3 * H), lambda c: (0, 0)),
            ],
            out_specs=[
                pl.BlockSpec((tc, B, H), lambda c: (c, 0, 0)),
                pl.BlockSpec((B, H), lambda c: (0, 0)),
            ],
            scratch_shapes=[pltpu.VMEM((B, H), jnp.float32)],
        ),
        compiler_params=pltpu.CompilerParams(dimension_semantics=("arbitrary",)),
    )(gi_all, h0, whh_bf, bhh)


# --------------------------------------------------------------------------
# Decoder recurrence: GRU step + attention + p_gen.  Emits h_t, context_t,
# pointer part ((1-pgen)*attn) and pgen; vocab head runs in a later kernel.
# --------------------------------------------------------------------------
def _decoder_recurrence_kernel(gi_ref, enc_ref, h0_ref, whh_ref, bhh_ref,
                               wa_ref, wgh_ref, wgc_ref, gb_ref,
                               h_out_ref, ctx_out_ref, ptr_out_ref, pgen_out_ref,
                               h_scratch):
    H = h_scratch.shape[-1]
    TC = gi_ref.shape[0]
    c = pl.program_id(0)

    @pl.when(c == 0)
    def _():
        h_scratch[...] = h0_ref[...]

    enc = enc_ref[...]            # (B, S, H) f32, grid-invariant, hoisted
    gb = gb_ref[...]              # (1, 1)

    def step(i, h):
        gvec = gi_ref[i]                                       # (B, 3H+1) f32
        gi = gvec[:, 0:3 * H]
        ge = gvec[:, 3 * H:3 * H + 1]                          # e @ gen_we
        gh = jnp.dot(h.astype(jnp.bfloat16), whh_ref[...],
                     preferred_element_type=jnp.float32) + bhh_ref[...]
        r = jax.nn.sigmoid(gi[:, 0:H] + gh[:, 0:H])
        z = jax.nn.sigmoid(gi[:, H:2 * H] + gh[:, H:2 * H])
        n = jnp.tanh(gi[:, 2 * H:3 * H] + r * gh[:, 2 * H:3 * H])
        h_new = (1.0 - z) * n + z * h

        # Attention over encoder states (MXU contractions, flash-attn style)
        q = jnp.dot(h_new.astype(jnp.bfloat16), wa_ref[...],
                    preferred_element_type=jnp.float32)        # (B, H)
        s3 = jnp.einsum('bqh,bsh->bqs', q[:, None, :], enc,
                        preferred_element_type=jnp.float32)    # (B, 1, S)
        s3 = s3 - jnp.max(s3, axis=-1, keepdims=True)
        e3 = jnp.exp(s3)
        a3 = e3 * pl.reciprocal(jnp.sum(e3, axis=-1, keepdims=True), approx=True)
        c3 = jnp.einsum('bqs,bsh->bqh', a3, enc,
                        preferred_element_type=jnp.float32)    # (B, 1, H)
        attn = a3[:, 0, :]                                     # (B, S)
        context = c3[:, 0, :]                                  # (B, H)

        pgen = jax.nn.sigmoid(
            jnp.dot(h_new, wgh_ref[...], preferred_element_type=jnp.float32)
            + jnp.dot(context, wgc_ref[...], preferred_element_type=jnp.float32)
            + ge + gb)                                         # (B, 1)

        h_out_ref[i] = h_new
        ctx_out_ref[i] = context
        ptr_out_ref[i] = (1.0 - pgen) * attn
        pgen_out_ref[i] = pgen
        return h_new

    h_final = jax.lax.fori_loop(0, TC, step, h_scratch[...], unroll=(TC <= 16))
    h_scratch[...] = h_final


def decoder_recurrence(gi_all, enc_bsh, h0, whh_bf, bhh, wa_bf,
                       gen_wh, gen_wc, gen_b):
    T, B, G = gi_all.shape
    H = h0.shape[-1]
    S = enc_bsh.shape[1]
    tc = _pick_chunk(T)
    const = lambda shape: pl.BlockSpec(shape, lambda c, _s=shape: tuple(0 for _ in _s))
    return pl.pallas_call(
        _decoder_recurrence_kernel,
        out_shape=(jax.ShapeDtypeStruct((T, B, H), jnp.float32),
                   jax.ShapeDtypeStruct((T, B, H), jnp.float32),
                   jax.ShapeDtypeStruct((T, B, S), jnp.float32),
                   jax.ShapeDtypeStruct((T, B, 1), jnp.float32)),
        grid_spec=pltpu.PrefetchScalarGridSpec(
            num_scalar_prefetch=0,
            grid=(T // tc,),
            in_specs=[
                pl.BlockSpec((tc, B, G), lambda c: (c, 0, 0)),
                const((B, S, H)),
                const((B, H)),
                const((H, 3 * H)), const((1, 3 * H)),
                const((H, H)),
                const((H, 1)), const((H, 1)), const((1, 1)),
            ],
            out_specs=[
                pl.BlockSpec((tc, B, H), lambda c: (c, 0, 0)),
                pl.BlockSpec((tc, B, H), lambda c: (c, 0, 0)),
                pl.BlockSpec((tc, B, S), lambda c: (c, 0, 0)),
                pl.BlockSpec((tc, B, 1), lambda c: (c, 0, 0)),
            ],
            scratch_shapes=[pltpu.VMEM((B, H), jnp.float32)],
        ),
        compiler_params=pltpu.CompilerParams(dimension_semantics=("arbitrary",)),
    )(gi_all, enc_bsh, h0, whh_bf, bhh, wa_bf, gen_wh, gen_wc, gen_b)


# --------------------------------------------------------------------------
# Fused vocab head + masked NLL loss (train).  Row-tiled over M = T*B; the
# (V+S)-wide probability tensor never touches HBM.  Gather first, log after.
# --------------------------------------------------------------------------
def _vocab_softmax(h_ref, ctx_ref, pgen_ref, wvh_ref, wvc_ref, bv_ref):
    logits = (jnp.dot(h_ref[...].astype(jnp.bfloat16), wvh_ref[...],
                      preferred_element_type=jnp.float32)
              + jnp.dot(ctx_ref[...].astype(jnp.bfloat16), wvc_ref[...],
                        preferred_element_type=jnp.float32)
              + bv_ref[...])
    logits = logits - jnp.max(logits, axis=-1, keepdims=True)
    e = jnp.exp(logits)
    vdist = e * pl.reciprocal(jnp.sum(e, axis=-1, keepdims=True), approx=True)
    return vdist * pgen_ref[...]                                # (tm, V)


def _vocab_loss_kernel(h_ref, ctx_ref, pgen_ref, ptr_ref, lbl_ref,
                       wvh_ref, wvc_ref, bv_ref, loss_ref, cnt_ref):
    i = pl.program_id(0)

    @pl.when(i == 0)
    def _():
        loss_ref[0, 0] = jnp.float32(0.0)
        cnt_ref[0, 0] = jnp.int32(0)

    vprob = _vocab_softmax(h_ref, ctx_ref, pgen_ref, wvh_ref, wvc_ref, bv_ref)
    tm, V = vprob.shape
    S = ptr_ref.shape[1]
    lbl = lbl_ref[...]                                          # (tm, 1) int32

    iota_v = jax.lax.broadcasted_iota(jnp.int32, (tm, V), 1)
    picked_v = jnp.sum(jnp.where(iota_v == lbl, vprob, 0.0),
                       axis=-1, keepdims=True)                  # (tm, 1)
    iota_s = jax.lax.broadcasted_iota(jnp.int32, (tm, S), 1)
    picked_p = jnp.sum(jnp.where(iota_s == (lbl - V), ptr_ref[...], 0.0),
                       axis=-1, keepdims=True)                  # (tm, 1)
    picked = picked_v + picked_p

    mask = lbl != 0
    loss = jnp.where(mask, -jnp.log(jnp.maximum(picked, 1e-10)), 0.0)
    loss_ref[0, 0] += jnp.sum(loss)
    cnt_ref[0, 0] += jnp.sum(mask.astype(jnp.int32))


def vocab_loss(h2d, ctx2d, pgen2d, ptr2d, lbl2d, wvh_bf, wvc_bf, bv):
    M, H = h2d.shape
    V = wvh_bf.shape[1]
    S = ptr2d.shape[1]
    tm = _pick_rows(M)
    row = lambda shape: pl.BlockSpec(shape, lambda i: (i, 0))
    const = lambda shape: pl.BlockSpec(shape, lambda i: (0, 0))
    return pl.pallas_call(
        _vocab_loss_kernel,
        out_shape=(jax.ShapeDtypeStruct((1, 1), jnp.float32),
                   jax.ShapeDtypeStruct((1, 1), jnp.int32)),
        grid_spec=pltpu.PrefetchScalarGridSpec(
            num_scalar_prefetch=0,
            grid=(M // tm,),
            in_specs=[row((tm, H)), row((tm, H)), row((tm, 1)),
                      row((tm, S)), row((tm, 1)),
                      const((H, V)), const((H, V)), const((1, V))],
            out_specs=(pl.BlockSpec(memory_space=pltpu.MemorySpace.SMEM),
                       pl.BlockSpec(memory_space=pltpu.MemorySpace.SMEM)),
        ),
        compiler_params=pltpu.CompilerParams(dimension_semantics=("arbitrary",)),
    )(h2d, ctx2d, pgen2d, ptr2d, lbl2d, wvh_bf, wvc_bf, bv)


# Vocab head producing probabilities (eval path only).
def _vocab_probs_kernel(h_ref, ctx_ref, pgen_ref, wvh_ref, wvc_ref, bv_ref, o_ref):
    o_ref[...] = _vocab_softmax(h_ref, ctx_ref, pgen_ref, wvh_ref, wvc_ref, bv_ref)


def vocab_probs(h2d, ctx2d, pgen2d, wvh_bf, wvc_bf, bv):
    M, H = h2d.shape
    V = wvh_bf.shape[1]
    tm = _pick_rows(M)
    row = lambda shape: pl.BlockSpec(shape, lambda i: (i, 0))
    const = lambda shape: pl.BlockSpec(shape, lambda i: (0, 0))
    return pl.pallas_call(
        _vocab_probs_kernel,
        out_shape=jax.ShapeDtypeStruct((M, V), jnp.float32),
        grid_spec=pltpu.PrefetchScalarGridSpec(
            num_scalar_prefetch=0,
            grid=(M // tm,),
            in_specs=[row((tm, H)), row((tm, H)), row((tm, 1)),
                      const((H, V)), const((H, V)), const((1, V))],
            out_specs=pl.BlockSpec((tm, V), lambda i: (i, 0)),
        ),
        compiler_params=pltpu.CompilerParams(dimension_semantics=("parallel",)),
    )(h2d, ctx2d, pgen2d, wvh_bf, wvc_bf, bv)


# --------------------------------------------------------------------------
# Parameter init (deterministic) + TransModel forward wrapper.
# --------------------------------------------------------------------------
def init_params(key, vocab_size, embedding_dim, hidden_size):
    ks = jax.random.split(key, 18)
    u = lambda k, s: jax.random.uniform(k, s, jnp.float32, -0.1, 0.1)
    V, E, H = vocab_size, embedding_dim, hidden_size
    return dict(
        enc_embed=u(ks[0], (V, E)),
        enc_wih=u(ks[1], (E, 3 * H)), enc_whh=u(ks[2], (H, 3 * H)),
        enc_bih=u(ks[3], (1, 3 * H)), enc_bhh=u(ks[4], (1, 3 * H)),
        dec_embed=u(ks[5], (V, E)),
        dec_wih=u(ks[6], (E, 3 * H)), dec_whh=u(ks[7], (H, 3 * H)),
        dec_bih=u(ks[8], (1, 3 * H)), dec_bhh=u(ks[9], (1, 3 * H)),
        attn_w=u(ks[10], (H, H)),
        out_wh=u(ks[11], (H, V)), out_wc=u(ks[12], (H, V)), out_b=u(ks[13], (1, V)),
        gen_wh=u(ks[14], (H, 1)), gen_wc=u(ks[15], (H, 1)),
        gen_we=u(ks[16], (E, 1)), gen_b=u(ks[17], (1, 1)),
    )


def trans_model_forward(params, sou, tar, extended_length=None, stage='train'):
    B, S = sou.shape
    _, T = tar.shape
    H = params['enc_whh'].shape[0]
    E = params['enc_embed'].shape[1]
    V = params['out_wh'].shape[1]
    f32, bf16 = jnp.float32, jnp.bfloat16

    # ---- Encoder: hoisted input projection + recurrence ----
    x_bf = params['enc_embed'].astype(bf16)[sou.T].reshape(S * B, E)   # time-major
    gi_enc = matmul_bias(x_bf, params['enc_wih'].astype(bf16),
                         params['enc_bih']).reshape(S, B, 3 * H)
    h0 = jnp.zeros((B, H), f32)
    enc_sbh, h_last = encoder_recurrence(gi_enc, h0,
                                         params['enc_whh'].astype(bf16),
                                         params['enc_bhh'])
    enc_bsh = jnp.transpose(enc_sbh, (1, 0, 2))                        # (B, S, H)

    # ---- Decoder: hoisted input projection (GRU gates + p_gen embed term) ----
    t_bf = params['dec_embed'].astype(bf16)[tar.T].reshape(T * B, E)
    w_cat = jnp.concatenate([params['dec_wih'], params['gen_we']], axis=1).astype(bf16)
    b_cat = jnp.concatenate([params['dec_bih'], jnp.zeros((1, 1), f32)], axis=1)
    gi_dec = matmul_bias(t_bf, w_cat, b_cat).reshape(T, B, 3 * H + 1)

    h_all, ctx_all, ptr_all, pgen_all = decoder_recurrence(
        gi_dec, enc_bsh, h_last,
        params['dec_whh'].astype(bf16), params['dec_bhh'],
        params['attn_w'].astype(bf16),
        params['gen_wh'], params['gen_wc'], params['gen_b'])

    h2d = h_all.reshape(T * B, H)
    ctx2d = ctx_all.reshape(T * B, H)
    pgen2d = pgen_all.reshape(T * B, 1)
    wvh_bf = params['out_wh'].astype(bf16)
    wvc_bf = params['out_wc'].astype(bf16)

    if stage == 'train':
        pads = jnp.zeros((B, 1), dtype=tar.dtype)
        label_bt = jnp.concatenate([tar, pads], axis=-1)[:, 1:].astype(jnp.int32)
        lbl2d = jnp.transpose(label_bt).reshape(T * B, 1)              # (T*B, 1)
        loss_sum, mask_sum = vocab_loss(h2d, ctx2d, pgen2d,
                                        ptr_all.reshape(T * B, S),
                                        lbl2d, wvh_bf, wvc_bf, params['out_b'])
        return loss_sum[0, 0], mask_sum[0, 0]
    else:  # 'dev' / 'test' : argmax over [p_gen*P_vocab, (1-p_gen)*attn]
        vprobs = vocab_probs(h2d, ctx2d, pgen2d, wvh_bf, wvc_bf, params['out_b'])
        full = jnp.concatenate([vprobs.reshape(T, B, V), ptr_all], axis=-1)
        return jnp.argmax(full, axis=-1).T                             # (B, T)


if __name__ == "__main__":
    B, S, T = 2, 8, 6          # batch, sou_len, target length
    V, E, H = 50, 32, 32       # vocab_size, embedding_dim, hidden_size

    key = jax.random.PRNGKey(0)
    kp, ksou, ktar = jax.random.split(key, 3)
    params = init_params(kp, V, E, H)
    sou = jax.random.randint(ksou, (B, S), 1, V, dtype=jnp.int32)
    tar = jax.random.randint(ktar, (B, T), 1, V, dtype=jnp.int32)

    loss_sum, mask_sum = trans_model_forward(params, sou, tar,
                                             extended_length=None, stage='train')
    jax.block_until_ready((loss_sum, mask_sum))
    print("KERNEL_OK")
</pallas_src>

<mosaic_0001>
module attributes {stable_mosaic.version = 11 : i64} {
  func.func @_matmul_bias_kernel(%arg0: i32, %arg1: i32, %arg2: memref<16x32xbf16, #tpu.memory_space<vmem>>, %arg3: memref<32x96xbf16, #tpu.memory_space<vmem>>, %arg4: memref<1x96xf32, #tpu.memory_space<vmem>>, %arg5: memref<16x96xf32, #tpu.memory_space<vmem>>) attributes {dimension_semantics = [#tpu.dimension_semantics<parallel>, #tpu.dimension_semantics<parallel>], iteration_bounds = array<i64: 1, 1>, scalar_prefetch = 0 : i64, scratch_operands = 0 : i64, tpu.core_type = #tpu.core_type<tc>, window_params = [{transform_indices = @transform_0, window_bounds = array<i64: 16, 32>}, {transform_indices = @transform_1, window_bounds = array<i64: 32, 96>}, {transform_indices = @transform_2, window_bounds = array<i64: 1, 96>}, {transform_indices = @transform_3, window_bounds = array<i64: 16, 96>}]} {
    %c0 = arith.constant 0 : index
    %c0_0 = arith.constant 0 : index
    %0 = vector.load %arg2[%c0, %c0_0] : memref<16x32xbf16, #tpu.memory_space<vmem>>, vector<16x32xbf16>
    %c0_1 = arith.constant 0 : index
    %c0_2 = arith.constant 0 : index
    %1 = vector.load %arg3[%c0_1, %c0_2] : memref<32x96xbf16, #tpu.memory_space<vmem>>, vector<32x96xbf16>
    %cst = arith.constant dense<0.000000e+00> : vector<16x96xf32>
    %2 = tpu.matmul %0, %1, %cst {dimension_numbers = #tpu.dot_dimension_numbers<[1], [0], [0], [1], [0, 0, 1, 1], [], []>} : vector<16x32xbf16>, vector<32x96xbf16>, vector<16x96xf32> -> vector<16x96xf32>
    %c0_3 = arith.constant 0 : index
    %c0_4 = arith.constant 0 : index
    %3 = vector.load %arg4[%c0_3, %c0_4] : memref<1x96xf32, #tpu.memory_space<vmem>>, vector<1x96xf32>
    %4 = vector.broadcast %3 : vector<1x96xf32> to vector<16x96xf32>
    %5 = arith.addf %2, %4 : vector<16x96xf32>
    %c0_5 = arith.constant 0 : index
    %c0_6 = arith.constant 0 : index
    %6 = vector.load %arg5[%c0_5, %c0_6] : memref<16x96xf32, #tpu.memory_space<vmem>>, vector<16x96xf32>
    tpu.vector_store %arg5[%c0_5, %c0_6], %5 {strides = array<i32>} : memref<16x96xf32, #tpu.memory_space<vmem>>, vector<16x96xf32>,
    return
  }
  func.func @transform_0(%arg0: i32, %arg1: i32) -> (i32, i32) {
    %c0_i32 = arith.constant 0 : i32
    %c0_i32_0 = arith.constant 0 : i32
    return %arg0, %c0_i32 : i32, i32
  }
  func.func @transform_1(%arg0: i32, %arg1: i32) -> (i32, i32) {
    %c0_i32 = arith.constant 0 : i32
    %c0_i32_0 = arith.constant 0 : i32
    return %c0_i32, %arg1 : i32, i32
  }
  func.func @transform_2(%arg0: i32, %arg1: i32) -> (i32, i32) {
    %c0_i32 = arith.constant 0 : i32
    %c0_i32_0 = arith.constant 0 : i32
    return %c0_i32, %arg1 : i32, i32
  }
  func.func @transform_3(%arg0: i32, %arg1: i32) -> (i32, i32) {
    %c0_i32 = arith.constant 0 : i32
    return %arg0, %arg1 : i32, i32
  }
}

</mosaic_0001>

<bundles_post_ra>
// kernel: tpu_custom_call.1
= control target key start
LH: loop header
LB: loop body
LE: loop exit
PB: predicated region body
PF: predicated region fallthrough
CT: control target
= control target key end

     0   :  { %8 = vsyncpa [#allocation3], 0  ;;  %s308_s0 = inlined_call_operand.hbm [shape: bf16[16,32], index: 0, kind: input, shape index: {}]   ;;  %s309_s1 = inlined_call_operand.hbm [shape: bf16[32,96], index: 1, kind: input, shape index: {}]   ;;  %s310_s2 = inlined_call_operand.vmem [shape: f32[1,96], index: 2, kind: input, shape index: {}]   ;;  %s311_s3 = inlined_call_operand.hbm [shape: f32[16,96], index: 3, kind: output, shape index: {}]  }
   0x1   :  { %9 = vsyncpa [#allocation6], 0 }
   0x2   :  { %10 = vsyncpa [#allocation4], 0  ;;  %s240_s12 = smov [#allocation2]   ;;  %s168_s16 = scalar_lea.hbm %s308_s0, 128 }
   0x3   :  { %s16_s13 = sshll.u32 %s240_s12, 4  ;;  %p169_p0 = scmp.ne.s32.totalorder %s308_s0, %s168_s16  ;;  %s17_s13 = int_to_ptr.vmem [resolvable:$true] %s16_s13 }
   0x4   :  { %p172_p1 = scmp.lt.u32.totalorder %s168_s16, %s308_s0 }
   0x6   :  { %p174_p2 = pnand %p172_p1, %p169_p0 }
   0x8   :  { %177 = shalt.err (!%p174_p2)
}
   0x9   :  { %s178_s21 = scalar_lea.vmem %s17_s13, 128  ;;  %p183_p4 = scmp.lt.s32.totalorder %s17_s13, %s17_s13 }
   0xa   :  { %p179_p3 = scmp.ne.s32.totalorder %s17_s13, %s178_s21  ;;  %p184_p5 = scmp.lt.s32.totalorder %s178_s21, %s178_s21 }
   0xc   :  { %p185_p6 = por %p184_p5, %p183_p4 }
   0xe   :  { %p186_p7 = pnand %p185_p6, %p179_p3 }
  0x10   :  { %189 = shalt.err (!%p186_p7)
}
  0x11   :  { %s241_s22 = smov 64   ;;  %s242_s23 = smov 4  }
  0x12   :  { %22 = dma.hbm_to_vmem [thread:$0]  %s308_s0, 128, %s17_s13, [#allocation3], %s241_s22, %s241_s22, %s242_s23  }
  0x13   :  { %s243_s26 = smov [#allocation5]   ;;  %s190_s30 = scalar_lea.hbm %s309_s1, 256 }
  0x14   :  { %s28_s27 = sshll.u32 %s243_s26, 4  ;;  %p191_p8 = scmp.ne.s32.totalorder %s309_s1, %s190_s30  ;;  %s29_s27 = int_to_ptr.vmem [resolvable:$true] %s28_s27 }
  0x15   :  { %p194_p9 = scmp.lt.u32.totalorder %s190_s30, %s309_s1 }
  0x17   :  { %p196_p10 = pnand %p194_p9, %p191_p8 }
  0x19   :  { %199 = shalt.err (!%p196_p10)
}
  0x1a   :  { %s200_s8 = scalar_lea.vmem %s29_s27, 256  ;;  %p205_p12 = scmp.lt.s32.totalorder %s29_s27, %s29_s27 }
  0x1b   :  { %p201_p11 = scmp.ne.s32.totalorder %s29_s27, %s200_s8  ;;  %p206_p13 = scmp.lt.s32.totalorder %s200_s8, %s200_s8 }
  0x1d   :  { %p207_p0 = por %p206_p13, %p205_p12 }
  0x1f   :  { %p208_p1 = pnand %p207_p0, %p201_p11 }
  0x21   :  { %211 = shalt.err (!%p208_p1)
}
  0x22   :  { %34 = dma.hbm_to_vmem [thread:$0]  %s309_s1, 256, %s29_s27, [#allocation6], %s241_s22, %s241_s22, %s242_s23  }
  0x23   :  { %234 = dma.done.wait [#allocation3], 128  }
  0x24   :  { %235 = vsyncadd [#allocation3], 4294967168 }
  0x25   :  { %236 = dma.done.wait [#allocation6], 256  }
  0x26   :  { %237 = vsyncadd [#allocation6], 4294967040  ;;  %v244_v0 = vmov 0.0   ;;  %vm245_vm0 = vmmov 0   ;;  %v165_v1 = vld [vmem:[#allocation5] sm:$0xff]   ;;  %v166_v2 = vld [vmem:[#allocation5 + $0x8] sm:$0xff]  }
  0x27   :  { %148 = vmatprep.subr.bf16.mxu0 %v244_v0  ;;  %152 = vmatprep.mubr.msk.bf16.mxu0 %vm245_vm0, %v244_v0  ;;  %v167_v3 = vld [vmem:[#allocation2] sm:$0xff]   ;;  %vm74_vm1 = vcmask 261120   ;;  %s246_s1 = smov [#allocation7]   ;;  %vm119_vm2 = vcmask 785408  }
  0x28   :  { %149 = vmatpush3.bf16.msra.mxu0 %v165_v1  ;;  %v140_v4 = vld [vmem:[%s310_s2] ss:$0 sm:$0xff]  ;;  %s127_s12 = sshll.u32 %s246_s1, 4  ;;  %s128_s12 = int_to_ptr.vmem [resolvable:$true] %s127_s12 }
  0x29   :  { %150 = vmatprep.subr.bf16.mxu0 %v244_v0  ;;  %s212_s13 = scalar_lea.vmem %s128_s12, 256  ;;  %p217_p3 = scmp.lt.s32.totalorder %s128_s12, %s128_s12 }
  0x2a   :  { %p213_p2 = scmp.ne.s32.totalorder %s128_s12, %s212_s13  ;;  %p218_p4 = scmp.lt.s32.totalorder %s212_s13, %s212_s13 }
  0x2c   :  { %151 = vmatpush3.bf16.msra.mxu0 %v166_v2  ;;  %p219_p5 = por %p218_p4, %p217_p3 }
  0x2e   :  { %p220_p6 = pnand %p219_p5, %p213_p2 }
  0x2f   :  { %153 = vmatmul.mubr.msk.bf16.vlgmr.msra.gmra.mrb[0].mxu0 %vm74_vm1, %v167_v3 }
 0x102   :  { %v112_v5 = vpop.f32.mrb[0].mxu0 }
 0x103   :  { %v113_v6 = vadd.f32 %v140_v4, %v112_v5  ;;  %v154_v7 = vpop.f32.mrb[1].mxu0 }
 0x104   :  { %v115_v8 = vpop.f32.mrb[2].mxu0 }
 0x105   :  { %120 = vst.msk [vmem:[#allocation7] sm:$0xff] %vm119_vm2, %v113_v6  ;;  %v116_v9 = vadd.f32 %v140_v4, %v115_v8  ;;  %v155_v10 = vpop.f32.mrb[3].mxu0 }
 0x107   :  { %121 = vst.msk [vmem:[#allocation7 + $0x8] sm:$0xff] %vm119_vm2, %v116_v9 }
 0x108   :  { %223 = shalt.err (!%p220_p6)
}
 0x109   :  { %s224_s15 = scalar_lea.hbm %s311_s3, 256 }
 0x10a   :  { %p225_p7 = scmp.ne.s32.totalorder %s311_s3, %s224_s15  ;;  %p228_p8 = scmp.lt.u32.totalorder %s224_s15, %s311_s3 }
 0x10c   :  { %p230_p9 = pnand %p228_p8, %p225_p7 }
 0x10e   :  { %233 = shalt.err (!%p230_p9)
}
 0x10f   :  { %s247_s20 = smov 128   ;;  %s248_s21 = smov 8  }
 0x110   :  { %133 = dma.vmem_to_hbm [thread:$0]  %s128_s12, 256, %s311_s3, [#allocation4], %s247_s20, %s247_s20, %s248_s21  }
 0x111   :  { %238 = dma.done.wait [#allocation4], 256  }
 0x112   :  { %239 = vsyncadd [#allocation4], 4294967040 }
 0x113   :  { %137 = vsyncpa [#allocation3], 1 }
 0x114   :  { %138 = vsyncpa [#allocation6], 1 }
 0x115   :  { %139 = vsyncpa [#allocation4], 1 }

</bundles_post_ra>
